<compile_context>
chip_gen: v6e
topology: v6e:2x2x1
jax: 0.10.0
libtpu: 0.0.40
codegen_flags: <defaults>
</compile_context>

<pallas_src>
import functools
import math

import numpy as np
import jax
import jax.numpy as jnp
from jax.experimental import pallas as pl
from jax.experimental.pallas import tpu as pltpu

FEAT = 26            # encoder feature dim (consistent with nn.Linear(26, 16))
LANE = 128           # TPU lane width
SUB = 8              # TPU sublane width
N_PAD = 128          # padded feature lanes
BLK_PAD = 32         # enc1 per-support contraction rows (>= FEAT, multiple of 16 for bf16)
ONE_COL = BLK_PAD - 1  # h column pinned to 1.0 (folds the enc1 bias); 31 >= FEAT


def _round_up(v, m):
    return (v + m - 1) // m * m


# ----------------------------------------------------------------------------
# Fused forward kernel
# ----------------------------------------------------------------------------
def _fused_forward_kernel(x_ref, w0_ref, w1_ref, zs_ref, hq_ref, *,
                          n_support, c_pad, cq_pad):
    """Entire midifewFinalNet.forward in one kernel.

    x_ref : (m_in_pad, k_pad)        bf16; support rows grouped by shot, bias col = 1
    w0_ref: (k_pad, N_PAD)           bf16; enc0 weight + bias row; col ONE_COL pins h==1
    w1_ref: (n_support, BLK_PAD, N_PAD) bf16; enc1 blocks (rows FEAT..35 dropped exactly),
                                     b1 folded into w1[0, ONE_COL, :FEAT]
    zs_ref: (c_pad, N_PAD)  f32      encoder[1] output rows (rows >= n_class discarded)
    hq_ref: (cq_pad, N_PAD) f32      query rows of encoder[0] output
    """
    # encoder[0]: Linear (+ folded bias column) + ReLU.  bf16 x bf16 -> f32 on MXU.
    # Columns FEAT..127 of h (except ONE_COL==1) are exactly zero because the padded
    # weight columns are zero and relu(0)==0 -> reproduces the Resize 26->36 pad free.
    h = jnp.maximum(
        jnp.dot(x_ref[...], w0_ref[...], preferred_element_type=jnp.float32),
        0.0)                                                  # (m_in_pad, N_PAD) f32

    # Query rows (torch.cat's xq part): tile-aligned, lane-dense full-slab store.
    q_off = n_support * c_pad
    hq_ref[...] = h[q_off:q_off + cq_pad, :]

    # encoder[1]: Flatten + Linear + ReLU without any reshape/gather.  Support rows
    # were laid out by the wrapper as n_support contiguous (c_pad, N_PAD) groups, so
    # this is one (c_pad, 32) @ (32, 128) matmul per support block; every weight
    # block is read exactly once.  h[:, ONE_COL] == 1 supplies the enc1 bias.
    hb = h[:, :BLK_PAD].astype(jnp.bfloat16)                  # (m_in_pad, BLK_PAD)
    acc = jnp.dot(hb[0:c_pad, :], w1_ref[0],
                  preferred_element_type=jnp.float32)         # (c_pad, N_PAD) f32
    for s in range(1, n_support):
        acc = acc + jnp.dot(hb[s * c_pad:(s + 1) * c_pad, :], w1_ref[s],
                            preferred_element_type=jnp.float32)
    zs_ref[...] = jnp.maximum(acc, 0.0)


# ----------------------------------------------------------------------------
# Parameter packing (done ONCE, not per forward call)
# ----------------------------------------------------------------------------
def pack_params(params, *, d_in, n_support):
    data_dim = FEAT
    need_dim = math.ceil(data_dim ** 0.5)          # 6 for 26
    # TODO(synk): the perfect-square data_dim branch of Resize (no pad / no reshape)
    # is not implemented; it changes encoder[1]'s expected input width.
    assert need_dim * need_dim > data_dim, "only the zero-pad Resize branch is supported"

    k_pad = _round_up(d_in + 1, LANE)              # +1 for the folded enc0 bias column

    # enc0 weight with bias folded as an extra input row; bf16 halves DMA bytes and
    # hits the native bf16 MXU path.
    w0 = jnp.zeros((k_pad, N_PAD), jnp.bfloat16)
    w0 = w0.at[:d_in, :FEAT].set(params["enc0_w"].astype(jnp.bfloat16))
    w0 = w0.at[d_in, :FEAT].set(params["enc0_b"].astype(jnp.bfloat16))
    w0 = w0.at[d_in, ONE_COL].set(1.0)             # pin h[:, ONE_COL] == 1 (for b1 fold)

    # enc1 weight: one (BLK_PAD, N_PAD) block per support sample.  Rows FEAT..35 of
    # each original 36x26 block always multiply the Resize zero padding -> dropping
    # them is exact.  128x128 f32 -> 32x128 bf16 is 16x less weight DMA.
    blk = need_dim * need_dim                      # 36
    w1_blocks = params["enc1_w"].astype(jnp.bfloat16).reshape(n_support, blk, FEAT)
    w1 = jnp.zeros((n_support, BLK_PAD, N_PAD), jnp.bfloat16)
    w1 = w1.at[:, :FEAT, :FEAT].set(w1_blocks[:, :FEAT, :])
    w1 = w1.at[0, ONE_COL, :FEAT].set(params["enc1_b"].astype(jnp.bfloat16))

    return {"w0": w0, "w1": w1}


# ----------------------------------------------------------------------------
# midifewFinalNet.forward wrapper — ONE jit around pad + pallas_call + unpad
# ----------------------------------------------------------------------------
@functools.partial(jax.jit, static_argnames=("n_class", "n_support", "n_query", "d_in"))
def midifew_final_net_forward(x, w0, w1, *, n_class, n_support, n_query, d_in):
    n_total = n_class * n_support + n_class * n_query
    assert x.shape == (n_total, d_in), x.shape        # fires at trace time under jit

    c_pad = _round_up(n_class, SUB)
    cq = n_class * n_query
    cq_pad = _round_up(cq, SUB)
    m_in_pad = n_support * c_pad + cq_pad
    k_pad = w0.shape[0]

    # Destination row for every sample: support sample (class c, shot s) goes to
    # row s*c_pad + c (grouped by shot), queries go after all support groups.
    idx = np.arange(n_class * n_support)
    sup_dest = (idx % n_support) * c_pad + idx // n_support
    q_dest = n_support * c_pad + np.arange(cq)
    dest = np.concatenate([sup_dest, q_dest])

    # Lane/sublane-dense bf16 input slab with the enc0 bias folded as a ones column.
    # All of this runs in the same jit as the kernel -> one tiny fusion, no extra
    # launches / HBM round trips.
    x_pad = jnp.zeros((m_in_pad, k_pad), jnp.bfloat16)
    x_pad = x_pad.at[dest, :d_in].set(x.astype(jnp.bfloat16))
    x_pad = x_pad.at[:, d_in].set(1.0)

    kernel = functools.partial(_fused_forward_kernel,
                               n_support=n_support, c_pad=c_pad, cq_pad=cq_pad)

    flops = 2 * m_in_pad * k_pad * N_PAD + 2 * n_support * c_pad * BLK_PAD * N_PAD
    bytes_accessed = 2 * (x_pad.size + w0.size + w1.size) + 4 * (c_pad + cq_pad) * N_PAD

    # Single tiny episode => no grid on purpose (a serial grid would be pure overhead;
    # add a leading 'parallel' episode axis only when batching many episodes).
    zs_pad, hq_pad = pl.pallas_call(
        kernel,
        out_shape=(jax.ShapeDtypeStruct((c_pad, N_PAD), jnp.float32),
                   jax.ShapeDtypeStruct((cq_pad, N_PAD), jnp.float32)),
        in_specs=[pl.BlockSpec(memory_space=pltpu.MemorySpace.VMEM)] * 3,
        out_specs=(pl.BlockSpec(memory_space=pltpu.MemorySpace.VMEM),
                   pl.BlockSpec(memory_space=pltpu.MemorySpace.VMEM)),
        cost_estimate=pl.CostEstimate(flops=flops, transcendentals=0,
                                      bytes_accessed=bytes_accessed),
    )(x_pad, w0, w1)

    # torch.cat([xs, xq], 0) with all padding stripped (fused into the same jit).
    return jnp.concatenate([zs_pad[:n_class, :FEAT], hq_pad[:cq, :FEAT]], axis=0)


# ----------------------------------------------------------------------------
# Parameter init (raw, unpadded — mirrors the synthesized PyTorch encoders)
# ----------------------------------------------------------------------------
def init_params(key, d_in, n_support, need_dim=6, feat=FEAT):
    k0, k1, k2, k3, k4, k5 = jax.random.split(key, 6)
    return {
        "enc0_w": 0.1 * jax.random.normal(k0, (d_in, feat), jnp.float32),
        "enc0_b": 0.1 * jax.random.normal(k1, (feat,), jnp.float32),
        "enc1_w": 0.1 * jax.random.normal(
            k2, (n_support * need_dim * need_dim, feat), jnp.float32),
        "enc1_b": 0.1 * jax.random.normal(k3, (feat,), jnp.float32),
        # self.linear = nn.Linear(26, 16): defined but unused in forward.
        "unused_linear_w": 0.1 * jax.random.normal(k4, (feat, 16), jnp.float32),
        "unused_linear_b": 0.1 * jax.random.normal(k5, (16,), jnp.float32),
    }


if __name__ == "__main__":
    n_class, n_support, n_query = 2, 3, 4
    d_in = 40
    n_total = n_class * n_support + n_class * n_query            # 14

    key = jax.random.PRNGKey(0)
    kx, kp = jax.random.split(key)
    x = jax.random.normal(kx, (n_total, d_in), jnp.float32)
    params = init_params(kp, d_in, n_support)
    packed = pack_params(params, d_in=d_in, n_support=n_support)

    out = midifew_final_net_forward(
        x, packed["w0"], packed["w1"],
        n_class=n_class, n_support=n_support, n_query=n_query, d_in=d_in)
    out = jax.block_until_ready(out)

    # Pure-JAX reference of the same forward semantics, with weights / matmul inputs
    # rounded to bf16 exactly as the kernel does (accumulation stays f32 in both, so
    # the comparison is tight).
    rnd = lambda a: a.astype(jnp.bfloat16).astype(jnp.float32)
    xr = rnd(x)
    h_ref = jnp.maximum(xr @ rnd(params["enc0_w"]) + rnd(params["enc0_b"]), 0.0)  # (14, 26)
    need_dim = math.ceil(FEAT ** 0.5)                                             # 6
    zs_in = rnd(h_ref[:n_class * n_support])      # kernel casts the enc1 LHS to bf16
    xs_pad = jnp.concatenate(
        [zs_in, jnp.zeros((n_class * n_support, need_dim * need_dim - FEAT),
                          jnp.float32)], axis=1)                                  # (6, 36)
    xs_flat = xs_pad.reshape(n_class, n_support * need_dim * need_dim)            # (2, 108)
    zs_ref = jnp.maximum(xs_flat @ rnd(params["enc1_w"]) + rnd(params["enc1_b"]), 0.0)
    ref = jnp.concatenate([zs_ref, h_ref[n_class * n_support:]], axis=0)          # (10, 26)

    assert out.shape == (n_class + n_class * n_query, FEAT), out.shape
    assert jnp.allclose(out, ref, atol=2e-3, rtol=2e-3), \
        float(jnp.max(jnp.abs(out - ref)))

    print("KERNEL_OK")
</pallas_src>

<mosaic_0001>
module attributes {stable_mosaic.version = 11 : i64} {
  func.func @_fused_forward_kernel(%arg0: memref<32x128xbf16, #tpu.memory_space<vmem>>, %arg1: memref<128x128xbf16, #tpu.memory_space<vmem>>, %arg2: memref<3x32x128xbf16, #tpu.memory_space<vmem>>, %arg3: memref<8x128xf32, #tpu.memory_space<vmem>>, %arg4: memref<8x128xf32, #tpu.memory_space<vmem>>) attributes {dimension_semantics = [], scalar_prefetch = 0 : i64, scratch_operands = 0 : i64, tpu.core_type = #tpu.core_type<tc>} {
    %c0 = arith.constant 0 : index
    %c0_0 = arith.constant 0 : index
    %0 = vector.load %arg0[%c0, %c0_0] : memref<32x128xbf16, #tpu.memory_space<vmem>>, vector<32x128xbf16>
    %c0_1 = arith.constant 0 : index
    %c0_2 = arith.constant 0 : index
    %1 = vector.load %arg1[%c0_1, %c0_2] : memref<128x128xbf16, #tpu.memory_space<vmem>>, vector<128x128xbf16>
    %cst = arith.constant dense<0.000000e+00> : vector<32x128xf32>
    %2 = tpu.matmul %0, %1, %cst {dimension_numbers = #tpu.dot_dimension_numbers<[1], [0], [0], [1], [0, 0, 1, 1], [], []>} : vector<32x128xbf16>, vector<128x128xbf16>, vector<32x128xf32> -> vector<32x128xf32>
    %cst_3 = arith.constant 0.000000e+00 : f32
    %3 = vector.broadcast %cst_3 : f32 to vector<32x128xf32>
    %4 = arith.maximumf %2, %3 : vector<32x128xf32>
    %5 = vector.extract_strided_slice %4 {offsets = [24, 0], sizes = [8, 128], strides = [1, 1]} : vector<32x128xf32> to vector<8x128xf32>
    %c0_4 = arith.constant 0 : index
    %c0_5 = arith.constant 0 : index
    %6 = vector.load %arg4[%c0_4, %c0_5] : memref<8x128xf32, #tpu.memory_space<vmem>>, vector<8x128xf32>
    tpu.vector_store %arg4[%c0_4, %c0_5], %5 {strides = array<i32>} : memref<8x128xf32, #tpu.memory_space<vmem>>, vector<8x128xf32>,
    %7 = vector.extract_strided_slice %4 {offsets = [0, 0], sizes = [32, 32], strides = [1, 1]} : vector<32x128xf32> to vector<32x32xf32>
    %8 = arith.truncf %7 : vector<32x32xf32> to vector<32x32xbf16>
    %9 = vector.extract_strided_slice %8 {offsets = [0, 0], sizes = [8, 32], strides = [1, 1]} : vector<32x32xbf16> to vector<8x32xbf16>
    %c0_6 = arith.constant 0 : index
    %c0_7 = arith.constant 0 : index
    %c0_8 = arith.constant 0 : index
    %10 = vector.load %arg2[%c0_6, %c0_7, %c0_8] : memref<3x32x128xbf16, #tpu.memory_space<vmem>>, vector<1x32x128xbf16>
    %11 = vector.shape_cast %10 : vector<1x32x128xbf16> to vector<32x128xbf16>
    %cst_9 = arith.constant dense<0.000000e+00> : vector<8x128xf32>
    %12 = tpu.matmul %9, %11, %cst_9 {dimension_numbers = #tpu.dot_dimension_numbers<[1], [0], [0], [1], [0, 0, 1, 1], [], []>} : vector<8x32xbf16>, vector<32x128xbf16>, vector<8x128xf32> -> vector<8x128xf32>
    %13 = vector.extract_strided_slice %8 {offsets = [8, 0], sizes = [8, 32], strides = [1, 1]} : vector<32x32xbf16> to vector<8x32xbf16>
    %c1 = arith.constant 1 : index
    %c0_10 = arith.constant 0 : index
    %c0_11 = arith.constant 0 : index
    %14 = vector.load %arg2[%c1, %c0_10, %c0_11] : memref<3x32x128xbf16, #tpu.memory_space<vmem>>, vector<1x32x128xbf16>
    %15 = vector.shape_cast %14 : vector<1x32x128xbf16> to vector<32x128xbf16>
    %cst_12 = arith.constant dense<0.000000e+00> : vector<8x128xf32>
    %16 = tpu.matmul %13, %15, %cst_12 {dimension_numbers = #tpu.dot_dimension_numbers<[1], [0], [0], [1], [0, 0, 1, 1], [], []>} : vector<8x32xbf16>, vector<32x128xbf16>, vector<8x128xf32> -> vector<8x128xf32>
    %17 = arith.addf %12, %16 : vector<8x128xf32>
    %18 = vector.extract_strided_slice %8 {offsets = [16, 0], sizes = [8, 32], strides = [1, 1]} : vector<32x32xbf16> to vector<8x32xbf16>
    %c2 = arith.constant 2 : index
    %c0_13 = arith.constant 0 : index
    %c0_14 = arith.constant 0 : index
    %19 = vector.load %arg2[%c2, %c0_13, %c0_14] : memref<3x32x128xbf16, #tpu.memory_space<vmem>>, vector<1x32x128xbf16>
    %20 = vector.shape_cast %19 : vector<1x32x128xbf16> to vector<32x128xbf16>
    %cst_15 = arith.constant dense<0.000000e+00> : vector<8x128xf32>
    %21 = tpu.matmul %18, %20, %cst_15 {dimension_numbers = #tpu.dot_dimension_numbers<[1], [0], [0], [1], [0, 0, 1, 1], [], []>} : vector<8x32xbf16>, vector<32x128xbf16>, vector<8x128xf32> -> vector<8x128xf32>
    %22 = arith.addf %17, %21 : vector<8x128xf32>
    %cst_16 = arith.constant 0.000000e+00 : f32
    %23 = vector.broadcast %cst_16 : f32 to vector<8x128xf32>
    %24 = arith.maximumf %22, %23 : vector<8x128xf32>
    %c0_17 = arith.constant 0 : index
    %c0_18 = arith.constant 0 : index
    %25 = vector.load %arg3[%c0_17, %c0_18] : memref<8x128xf32, #tpu.memory_space<vmem>>, vector<8x128xf32>
    tpu.vector_store %arg3[%c0_17, %c0_18], %24 {strides = array<i32>} : memref<8x128xf32, #tpu.memory_space<vmem>>, vector<8x128xf32>,
    return
  }
}

</mosaic_0001>

<bundles_post_ra>
// kernel: midifew_final_net_forward.1
= control target key start
LH: loop header
LB: loop body
LE: loop exit
PB: predicated region body
PF: predicated region fallthrough
CT: control target
= control target key end

     0   :  { %v454_v11 = vmov 0.0   ;;  %vm455_vm0 = vmmov 0   ;;  %vm176_vm1 = vcmask 261120   ;;  %s541_s1 = inlined_call_operand.vmem [shape: bf16[128,128], index: 1, kind: input, shape index: {}]   ;;  %s542_s0 = inlined_call_operand.vmem [shape: bf16[32,128], index: 0, kind: input, shape index: {}]   ;;  %s543_s2 = inlined_call_operand.vmem [shape: bf16[3,32,128], index: 2, kind: input, shape index: {}]   ;;  %s544_s4 = inlined_call_operand.vmem [shape: f32[8,128], index: 4, kind: output, shape index: {1}]   ;;  %s545_s3 = inlined_call_operand.vmem [shape: f32[8,128], index: 3, kind: output, shape index: {0}]  }
   0x1   :  { %v438_v0 = vld [vmem:[%s541_s1 + $0x38] sm:$0xff]   ;;  %v439_v1 = vld [vmem:[%s541_s1 + $0x30] sm:$0xff]   ;;  %v440_v2 = vld [vmem:[%s541_s1 + $0x28] sm:$0xff]   ;;  %412 = vmatprep.subr.bf16.mxu1 %v454_v11  ;;  %416 = vmatprep.mubr.msk.bf16.mxu1 %vm455_vm0, %v454_v11 }
   0x2   :  { %392 = vmatprep.subr.bf16.mxu0 %v438_v0  ;;  %v441_v3 = vld [vmem:[%s541_s1 + $0x20] sm:$0xff]   ;;  %v442_v5 = vld [vmem:[%s541_s1 + $0x18] sm:$0xff]   ;;  %v443_v6 = vld [vmem:[%s541_s1 + $0x10] sm:$0xff]  }
   0x3   :  { %393 = vmatpush3.bf16.msra.mxu0 %v438_v0  ;;  %v446_v4 = vld [vmem:[%s542_s0] sm:$0xff]   ;;  %v444_v7 = vld [vmem:[%s541_s1 + $0x8] sm:$0xff]   ;;  %v448_v10 = vld [vmem:[%s543_s2 + $0x18] sm:$0xff]  }
   0x4   :  { %394 = vmatprep.subr.bf16.mxu0 %v439_v1  ;;  %408 = vmatprep.mubr.bf16.mxu0 %v446_v4  ;;  %v445_v8 = vld [vmem:[%s541_s1] sm:$0xff]   ;;  %v447_v9 = vld [vmem:[%s542_s0 + $0x8] sm:$0xff]   ;;  %v449_v12 = vld [vmem:[%s543_s2 + $0x10] sm:$0xff]  }
   0x5   :  { %413 = vmatpush3.bf16.msra.mxu1 %v448_v10  ;;  %v450_v21 = vld [vmem:[%s543_s2 + $0x8] sm:$0xff]   ;;  %v451_v23 = vld [vmem:[%s543_s2] sm:$0xff]  }
   0x6   :  { %414 = vmatprep.subr.bf16.mxu1 %v454_v11  ;;  %v452_v24 = vld [vmem:[%s543_s2 + $0x28] sm:$0xff]   ;;  %v453_v25 = vld [vmem:[%s543_s2 + $0x20] sm:$0xff]  }
   0x7   :  { %395 = vmatpush3.bf16.msra.mxu0 %v439_v1 }
   0x8   :  { %396 = vmatprep.subr.bf16.mxu0 %v440_v2 }
   0x9   :  { %415 = vmatpush3.bf16.msra.mxu1 %v449_v12 }
   0xa   :  { %420 = vmatprep.subr.bf16.mxu1 %v454_v11 }
   0xb   :  { %397 = vmatpush3.bf16.msra.mxu0 %v440_v2 }
   0xc   :  { %398 = vmatprep.subr.bf16.mxu0 %v441_v3 }
   0xf   :  { %399 = vmatpush3.bf16.msra.mxu0 %v441_v3 }
  0x10   :  { %400 = vmatprep.subr.bf16.mxu0 %v442_v5 }
  0x13   :  { %401 = vmatpush3.bf16.msra.mxu0 %v442_v5 }
  0x14   :  { %402 = vmatprep.subr.bf16.mxu0 %v443_v6 }
  0x17   :  { %403 = vmatpush3.bf16.msra.mxu0 %v443_v6 }
  0x18   :  { %404 = vmatprep.subr.bf16.mxu0 %v444_v7 }
  0x1b   :  { %405 = vmatpush3.bf16.msra.mxu0 %v444_v7 }
  0x1c   :  { %406 = vmatprep.subr.bf16.mxu0 %v445_v8 }
  0x1f   :  { %407 = vmatpush3.bf16.msra.mxu0 %v445_v8 }
  0x22   :  { %409 = vmatmul.mubr.bf16.vlgmr.msra.gmra.mxu0 %v447_v9 }
  0xe2   :  { %v410_v13 = vpop.f32.mrf.mxu0 }
  0xe3   :  { %v148_v26 = vmax.f32 %v410_v13, 0.0 }
  0xe4   :  { %v131_v14 = vpop.f32.mrf.mxu0 }
  0xe5   :  { %v146_v18 = vmax.f32 %v131_v14, 0.0 }
  0xe6   :  { %v411_v15 = vpop.f32.mrf.mxu0 }
  0xe7   :  { %v149_v16 = vmax.f32 %v411_v15, 0.0 }
  0xe8   :  { %v134_v17 = vpop.f32.mrf.mxu0 }
  0xe9   :  { %150 = vst [vmem:[%s544_s4] sm:$0xff] %v149_v16  ;;  %v147_v19 = vmax.f32 %v134_v17, 0.0  ;;  %v152_v27 = vpack.c.bf16 %v149_v16, %v148_v26 }
  0xeb   :  { %v151_v20 = vpack.c.bf16 %v147_v19, %v146_v18 }
  0xed   :  { %v163_v22 = vrot.slane %v151_v20, 4 }
  0xef   :  { %417 = vmatmul.mubr.msk.bf16.vlgmr.msra.gmra.mxu1 %vm176_vm1, %v163_v22 }
  0xf0   :  { %421 = vmatpush3.bf16.msra.mxu1 %v450_v21  ;;  %424 = vmatprep.mubr.msk.bf16.mxu1 %vm455_vm0, %v454_v11 }
  0xf1   :  { %422 = vmatprep.subr.bf16.mxu1 %v454_v11 }
  0xf4   :  { %423 = vmatpush3.bf16.msra.mxu1 %v451_v23 }
  0xf5   :  { %428 = vmatprep.subr.bf16.mxu1 %v454_v11 }
  0xf7   :  { %425 = vmatmul.mubr.msk.bf16.vlgmr.msra.gmra.mxu1 %vm176_vm1, %v151_v20 }
  0xf8   :  { %429 = vmatpush3.bf16.msra.mxu1 %v452_v24  ;;  %432 = vmatprep.mubr.msk.bf16.mxu1 %vm455_vm0, %v454_v11 }
  0xf9   :  { %430 = vmatprep.subr.bf16.mxu1 %v454_v11 }
  0xfc   :  { %431 = vmatpush3.bf16.msra.mxu1 %v453_v25 }
  0xff   :  { %433 = vmatmul.mubr.msk.bf16.vlgmr.msra.gmra.mxu1 %vm176_vm1, %v152_v27 }
 0x1af   :  { %v214_v28 = vpop.f32.mrf.mxu1 }
 0x1b1   :  { %v418_v29 = vpop.f32.mrf.mxu1 }
 0x1b3   :  { %v217_v30 = vpop.f32.mrf.mxu1 }
 0x1b5   :  { %v419_v31 = vpop.f32.mrf.mxu1 }
 0x1b7   :  { %v269_v32 = vpop.f32.mrf.mxu1 }
 0x1b8   :  { %v270_v36 = vadd.f32 %v269_v32, %v214_v28 }
 0x1b9   :  { %v426_v33 = vpop.f32.mrf.mxu1 }
 0x1bb   :  { %v272_v34 = vpop.f32.mrf.mxu1 }
 0x1bd   :  { %v427_v35 = vpop.f32.mrf.mxu1 }
 0x1bf   :  { %v329_v37 = vpop.f32.mrf.mxu1 }
 0x1c0   :  { %v335_v38 = vadd.f32 %v329_v37, %v270_v36 }
 0x1c1   :  { %v434_v39 = vpop.f32.mrf.mxu1 }
 0x1c2   :  { %v336_v40 = vmax.f32 %v335_v38, 0.0 }
 0x1c3   :  { %v332_v41 = vpop.f32.mrf.mxu1 }
 0x1c4   :  { %337 = vst [vmem:[%s545_s3] sm:$0xff] %v336_v40 }
 0x1c5   :  { %v435_v42 = vpop.f32.mrf.mxu1 }

</bundles_post_ra>
